<compile_context>
chip_gen: v7x
topology: tpu7x:2x2x1
jax: 0.10.0
libtpu: 0.0.40
codegen_flags: <defaults>
</compile_context>

<pallas_src>
import jax
import jax.numpy as jnp
from jax.experimental import pallas as pl
from jax.experimental.pallas import tpu as pltpu

EPS = 1e-3  # nn.BatchNorm2d(eps=0.001)


# ---------------------------------------------------------------------------
# Kernel factory: one grid step == B images; every tensor is a lane-dense
# 2-D (rows, lanes) slab.  img_h is the per-image height (static).
# ---------------------------------------------------------------------------
def _make_kernel(img_h):
    def kernel(x_ref, params_ref, w1_ref, w2_ref, ws_ref, o_ref):
        M, WCin = x_ref.shape                 # M = B * img_h rows
        WCout = o_ref.shape[-1]

        x = x_ref[...]                                        # (M, W*Cin) f32

        # Packed scalar-ish params (one small input, one DMA descriptor).
        mean = params_ref[0:1, :WCin]                         # (1, W*Cin)
        istd = params_ref[1:2, :WCin]
        b1 = params_ref[2:3, :WCout]                          # (1, W*Cout)
        b2s = params_ref[3:4, :WCout]                         # conv2 + shortcut bias

        # ---- shortcut: 1x1 conv on the ORIGINAL input (block-diag weight) ---
        res = jnp.dot(x.astype(jnp.bfloat16), ws_ref[...],
                      preferred_element_type=jnp.float32)     # (M, W*Cout)

        # ---- BatchNorm2d: training-mode global batch stats (precomputed) ----
        xn = (x - mean) * istd                                # f32 VPU
        xb = xn.astype(jnp.bfloat16)

        # Per-image row index -> (M, 1) mask columns, broadcast across lanes.
        row = jax.lax.broadcasted_iota(jnp.int32, (M, 1), 0)
        if (img_h & (img_h - 1)) == 0:        # power-of-two H: cheap AND
            rowmod = jnp.bitwise_and(row, img_h - 1)
        else:                                 # general fallback
            rowmod = jax.lax.rem(row, img_h)
        not_top = rowmod >= 1                 # kills dy=0 wraparound / padding
        not_bot = rowmod <= img_h - 2         # kills dy=2 wraparound / padding

        def conv3x3(lhs_bf16, w_ref, acc0):
            # w_ref: (3, K, W*Cout) block-Toeplitz weights; dy==1 unshifted.
            # Consume each tap before issuing the next (one live f32 tap).
            acc = acc0 + jnp.dot(lhs_bf16, w_ref[1],
                                 preferred_element_type=jnp.float32)
            t0 = jnp.dot(lhs_bf16, w_ref[0],
                         preferred_element_type=jnp.float32)
            acc = acc + jnp.where(not_top, pltpu.roll(t0, 1, 0), 0.0)      # dy=0
            t2 = jnp.dot(lhs_bf16, w_ref[2],
                         preferred_element_type=jnp.float32)
            acc = acc + jnp.where(not_bot, pltpu.roll(t2, M - 1, 0), 0.0)  # dy=2
            return acc

        # ---- conv1 (bias in accumulator init) -------------------------------
        acc1 = conv3x3(xb, w1_ref, b1)

        # ---- SiLU (f32 VPU/EUP) ----------------------------------------------
        act = acc1 * jax.nn.sigmoid(acc1)

        # ---- conv2 (+ conv2 & shortcut biases) + residual add ----------------
        acc2 = conv3x3(act.astype(jnp.bfloat16), w2_ref, res + b2s)

        # ---- lane-dense (W*Cout wide) unmasked output store ------------------
        o_ref[...] = acc2

    return kernel


# ---------------------------------------------------------------------------
# One-time weight transforms (run under jit in the wrapper).
# ---------------------------------------------------------------------------
def _row_toeplitz_weights(w, width):
    """(3, 3, Cin, Cout) 3x3 kernel -> (3, W*Cin, W*Cout) block-Toeplitz.

    W_dy[xi*Cin + c, xo*Cout + o] = w[dy, xi - xo + 1, c, o] (zero outside the
    kernel), so a single lane-dense MXU matmul realises all horizontal taps
    plus the 'same' horizontal zero padding for one vertical offset dy.
    """
    kh, kw, cin, cout = w.shape
    xi = jnp.arange(width)[:, None]
    xo = jnp.arange(width)[None, :]
    dx = xi - xo + (kw // 2)
    valid = (dx >= 0) & (dx < kw)
    taps = w[:, jnp.clip(dx, 0, kw - 1)]                      # (3, W, W, Cin, Cout)
    taps = jnp.where(valid[None, :, :, None, None], taps, 0.0)
    taps = jnp.transpose(taps, (0, 1, 3, 2, 4))               # (3, W, Cin, W, Cout)
    return taps.reshape(kh, width * cin, width * cout)


def _block_diag_weights(ws, width):
    """(Cin, Cout) 1x1 kernel -> (W*Cin, W*Cout) block-diagonal weight."""
    cin, cout = ws.shape
    eye = jnp.eye(width, dtype=ws.dtype)
    return jnp.einsum("xy,co->xcyo", eye, ws).reshape(width * cin, width * cout)


def _pick_batch_tile(n, h, target_rows=256):
    """Images per grid step: largest divisor B of n with B*h <= target_rows
    (fills a 256-row MXU on v6e/v7x; ~128 already fills v5e), while keeping
    at least 2 grid steps when n >= 2 so v7x's two TensorCores both get work.
    """
    divisors = [d for d in range(1, n + 1) if n % d == 0]
    fits = [d for d in divisors if d * h <= target_rows] or [1]
    b = max(fits)
    if n >= 2:
        two_step = [d for d in fits if n // d >= 2]
        if two_step:
            b = max(two_step)
    return b


# ---------------------------------------------------------------------------
# Wrapper.
# ---------------------------------------------------------------------------
@jax.jit
def residual_block(x_nchw, w1, b1, w2, b2, ws, bs):
    """x_nchw: (N, Cin, H, W) f32. Returns (N, Cout, H, W) f32 (stride=1 path)."""
    N, Cin, H, W = x_nchw.shape
    Cout = w1.shape[-1]
    assert H % 8 == 0, "H must be a multiple of 8 (f32 sublane tiling)"

    # BN pre-pass: single-pass global batch statistics, reduced directly from
    # the NCHW input so it does not serialise behind the NHWC transpose.
    # (Must stay global over (N,H,W) to preserve train-mode BN semantics.)
    cnt = N * H * W
    s = jnp.sum(x_nchw, axis=(0, 2, 3))
    s2 = jnp.sum(x_nchw * x_nchw, axis=(0, 2, 3))
    mean = s / cnt
    var = s2 / cnt - mean * mean                              # biased variance
    istd = jax.lax.rsqrt(var + EPS)

    # NCHW -> lane-dense NHWC slab (module interface is NCHW; an NHWC-native
    # caller would skip this transpose entirely).
    x2d = jnp.transpose(x_nchw, (0, 2, 3, 1)).reshape(N * H, W * Cin)

    WCin, WCout = W * Cin, W * Cout
    PW = max(WCin, WCout)

    # Pack the four tiny per-lane params into ONE small input.
    params = jnp.zeros((4, PW), jnp.float32)
    params = params.at[0, :WCin].set(jnp.tile(mean, W))
    params = params.at[1, :WCin].set(jnp.tile(istd, W))
    params = params.at[2, :WCout].set(jnp.tile(b1.reshape(-1), W))
    params = params.at[3, :WCout].set(jnp.tile((b2 + bs).reshape(-1), W))

    # Weight transforms -> bf16 for the MXU (f32 accumulation in-kernel).
    w1t = _row_toeplitz_weights(w1, W).astype(jnp.bfloat16)   # (3, W*Cin, W*Cout)
    w2t = _row_toeplitz_weights(w2, W).astype(jnp.bfloat16)   # (3, W*Cout, W*Cout)
    wst = _block_diag_weights(ws, W).astype(jnp.bfloat16)     # (W*Cin, W*Cout)

    B = _pick_batch_tile(N, H)                                # images per step
    BH = B * H

    def full(shape):
        return pl.BlockSpec(shape, lambda n, _s=shape: (0,) * len(_s))

    out2d = pl.pallas_call(
        _make_kernel(H),
        out_shape=jax.ShapeDtypeStruct((N * H, WCout), jnp.float32),
        grid=(N // B,),
        in_specs=[
            pl.BlockSpec((BH, WCin), lambda n: (n, 0)),       # B images / step
            full((4, PW)),                                    # packed BN/bias params
            full((3, WCin, WCout)),                           # conv1 Toeplitz w
            full((3, WCout, WCout)),                          # conv2 Toeplitz w
            full((WCin, WCout)),                              # shortcut block-diag w
        ],
        out_specs=pl.BlockSpec((BH, WCout), lambda n: (n, 0)),
        compiler_params=pltpu.CompilerParams(
            dimension_semantics=("parallel",),
            # No vmem_limit override: working set is ~2-3 MB, and 64 MiB is the
            # entire physical VMEM on v7x (no headroom for compiler scratch).
        ),
    )(x2d, params, w1t, w2t, wst)

    out = out2d.reshape(N, H, W, Cout)
    return jnp.transpose(out, (0, 3, 1, 2))                   # NHWC -> NCHW


# ---------------------------------------------------------------------------
# Pure-JAX f32 reference mirroring the PyTorch module (train-mode BN).
# ---------------------------------------------------------------------------
def reference(x_nchw, w1, b1, w2, b2, ws, bs):
    x = jnp.transpose(x_nchw, (0, 2, 3, 1))
    dn = ('NHWC', 'HWIO', 'NHWC')
    res = jax.lax.conv_general_dilated(x, ws[None, None], (1, 1), 'SAME',
                                       dimension_numbers=dn) + bs
    mean = jnp.mean(x, axis=(0, 1, 2), keepdims=True)
    var = jnp.mean((x - mean) ** 2, axis=(0, 1, 2), keepdims=True)
    xn = (x - mean) / jnp.sqrt(var + EPS)
    out = jax.lax.conv_general_dilated(xn, w1, (1, 1), 'SAME',
                                       dimension_numbers=dn) + b1
    out = out * jax.nn.sigmoid(out)
    out = jax.lax.conv_general_dilated(out, w2, (1, 1), 'SAME',
                                       dimension_numbers=dn) + b2
    out = out + res
    return jnp.transpose(out, (0, 3, 1, 2))


if __name__ == "__main__":
    # Small shapes consistent with the module's forward (stride=1, Cin != Cout).
    N, Cin, Cout, H, W = 2, 8, 16, 16, 16

    key = jax.random.PRNGKey(0)
    kx, k1, kb1, k2, kb2, ks, kbs = jax.random.split(key, 7)

    x = jax.random.normal(kx, (N, Cin, H, W), jnp.float32)
    # Synthetic parameters generated directly in (kh, kw, Cin, Cout) layout.
    w1 = jax.random.normal(k1, (3, 3, Cin, Cout), jnp.float32) * 0.05
    b1 = jax.random.normal(kb1, (1, Cout), jnp.float32) * 0.05
    w2 = jax.random.normal(k2, (3, 3, Cout, Cout), jnp.float32) * 0.05
    b2 = jax.random.normal(kb2, (1, Cout), jnp.float32) * 0.05
    ws = jax.random.normal(ks, (Cin, Cout), jnp.float32) * 0.05   # 1x1 shortcut
    bs = jax.random.normal(kbs, (1, Cout), jnp.float32) * 0.05

    out = jax.block_until_ready(residual_block(x, w1, b1, w2, b2, ws, bs))
    ref = reference(x, w1, b1, w2, b2, ws, bs)

    max_err = float(jnp.max(jnp.abs(out - ref)))
    mean_err = float(jnp.mean(jnp.abs(out - ref)))
    assert out.shape == (N, Cout, H, W), out.shape
    # bf16 MXU inputs (f32 accumulation) widen the tolerance vs. the all-f32
    # reference; with f32 matmul inputs this kernel matches to <1e-3.
    assert max_err < 3e-2, f"max abs error vs reference: {max_err}"
    assert mean_err < 3e-3, f"mean abs error vs reference: {mean_err}"

    print("KERNEL_OK")
</pallas_src>

<mosaic_0001>
module attributes {stable_mosaic.version = 11 : i64} {
  func.func @kernel(%arg0: i32, %arg1: memref<16x128xf32, #tpu.memory_space<vmem>>, %arg2: memref<4x256xf32, #tpu.memory_space<vmem>>, %arg3: memref<3x128x256xbf16, #tpu.memory_space<vmem>>, %arg4: memref<3x256x256xbf16, #tpu.memory_space<vmem>>, %arg5: memref<128x256xbf16, #tpu.memory_space<vmem>>, %arg6: memref<16x256xf32, #tpu.memory_space<vmem>>) attributes {dimension_semantics = [#tpu.dimension_semantics<parallel>], iteration_bounds = array<i64: 2>, scalar_prefetch = 0 : i64, scratch_operands = 0 : i64, tpu.core_type = #tpu.core_type<tc>, window_params = [{transform_indices = @transform_0, window_bounds = array<i64: 16, 128>}, {pipeline_mode = #tpu.pipeline_mode<synchronous>, transform_indices = @transform_1, window_bounds = array<i64: 4, 256>}, {pipeline_mode = #tpu.pipeline_mode<synchronous>, transform_indices = @transform_2, window_bounds = array<i64: 3, 128, 256>}, {pipeline_mode = #tpu.pipeline_mode<synchronous>, transform_indices = @transform_3, window_bounds = array<i64: 3, 256, 256>}, {pipeline_mode = #tpu.pipeline_mode<synchronous>, transform_indices = @transform_4, window_bounds = array<i64: 128, 256>}, {transform_indices = @transform_5, window_bounds = array<i64: 16, 256>}]} {
    %c0 = arith.constant 0 : index
    %c0_0 = arith.constant 0 : index
    %0 = vector.load %arg1[%c0, %c0_0] : memref<16x128xf32, #tpu.memory_space<vmem>>, vector<16x128xf32>
    %c0_1 = arith.constant 0 : index
    %c0_2 = arith.constant 0 : index
    %1 = vector.load %arg2[%c0_1, %c0_2] : memref<4x256xf32, #tpu.memory_space<vmem>>, vector<1x128xf32>
    %c1 = arith.constant 1 : index
    %c0_3 = arith.constant 0 : index
    %2 = vector.load %arg2[%c1, %c0_3] : memref<4x256xf32, #tpu.memory_space<vmem>>, vector<1x128xf32>
    %c2 = arith.constant 2 : index
    %c0_4 = arith.constant 0 : index
    %3 = vector.load %arg2[%c2, %c0_4] : memref<4x256xf32, #tpu.memory_space<vmem>>, vector<1x256xf32>
    %c3 = arith.constant 3 : index
    %c0_5 = arith.constant 0 : index
    %4 = vector.load %arg2[%c3, %c0_5] : memref<4x256xf32, #tpu.memory_space<vmem>>, vector<1x256xf32>
    %5 = arith.truncf %0 : vector<16x128xf32> to vector<16x128xbf16>
    %c0_6 = arith.constant 0 : index
    %c0_7 = arith.constant 0 : index
    %6 = vector.load %arg5[%c0_6, %c0_7] : memref<128x256xbf16, #tpu.memory_space<vmem>>, vector<128x256xbf16>
    %cst = arith.constant dense<0.000000e+00> : vector<16x256xf32>
    %7 = tpu.matmul %5, %6, %cst {dimension_numbers = #tpu.dot_dimension_numbers<[1], [0], [0], [1], [0, 0, 1, 1], [], []>} : vector<16x128xbf16>, vector<128x256xbf16>, vector<16x256xf32> -> vector<16x256xf32>
    %8 = vector.broadcast %1 : vector<1x128xf32> to vector<16x128xf32>
    %9 = arith.subf %0, %8 : vector<16x128xf32>
    %10 = vector.broadcast %2 : vector<1x128xf32> to vector<16x128xf32>
    %11 = arith.mulf %9, %10 : vector<16x128xf32>
    %12 = arith.truncf %11 : vector<16x128xf32> to vector<16x128xbf16>
    %13 = tpu.iota {dimensions = array<i32: 0>} : vector<16x1xi32>
    %c15_i32 = arith.constant 15 : i32
    %14 = vector.broadcast %c15_i32 : i32 to vector<16x1xi32>
    %15 = arith.andi %13, %14 : vector<16x1xi32>
    %c1_i32 = arith.constant 1 : i32
    %16 = vector.broadcast %c1_i32 : i32 to vector<16x1xi32>
    %17 = arith.cmpi sge, %15, %16 : vector<16x1xi32>
    %c14_i32 = arith.constant 14 : i32
    %18 = vector.broadcast %c14_i32 : i32 to vector<16x1xi32>
    %19 = arith.cmpi sle, %15, %18 : vector<16x1xi32>
    %c1_8 = arith.constant 1 : index
    %c0_9 = arith.constant 0 : index
    %c0_10 = arith.constant 0 : index
    %20 = vector.load %arg3[%c1_8, %c0_9, %c0_10] : memref<3x128x256xbf16, #tpu.memory_space<vmem>>, vector<1x128x256xbf16>
    %21 = vector.shape_cast %20 : vector<1x128x256xbf16> to vector<128x256xbf16>
    %cst_11 = arith.constant dense<0.000000e+00> : vector<16x256xf32>
    %22 = tpu.matmul %12, %21, %cst_11 {dimension_numbers = #tpu.dot_dimension_numbers<[1], [0], [0], [1], [0, 0, 1, 1], [], []>} : vector<16x128xbf16>, vector<128x256xbf16>, vector<16x256xf32> -> vector<16x256xf32>
    %23 = vector.broadcast %3 : vector<1x256xf32> to vector<16x256xf32>
    %24 = arith.addf %23, %22 : vector<16x256xf32>
    %c0_12 = arith.constant 0 : index
    %c0_13 = arith.constant 0 : index
    %c0_14 = arith.constant 0 : index
    %25 = vector.load %arg3[%c0_12, %c0_13, %c0_14] : memref<3x128x256xbf16, #tpu.memory_space<vmem>>, vector<1x128x256xbf16>
    %26 = vector.shape_cast %25 : vector<1x128x256xbf16> to vector<128x256xbf16>
    %cst_15 = arith.constant dense<0.000000e+00> : vector<16x256xf32>
    %27 = tpu.matmul %12, %26, %cst_15 {dimension_numbers = #tpu.dot_dimension_numbers<[1], [0], [0], [1], [0, 0, 1, 1], [], []>} : vector<16x128xbf16>, vector<128x256xbf16>, vector<16x256xf32> -> vector<16x256xf32>
    %c1_i32_16 = arith.constant 1 : i32
    %28 = tpu.dynamic_rotate %27 by %c1_i32_16 dim 0 : vector<16x256xf32>, i32 -> vector<16x256xf32>
    %cst_17 = arith.constant 0.000000e+00 : f32
    %29 = vector.shape_cast %17 : vector<16x1xi1> to vector<16x1xi1>
    %30 = vector.broadcast %29 : vector<16x1xi1> to vector<16x256xi1>
    %31 = vector.broadcast %cst_17 : f32 to vector<16x256xf32>
    %32 = arith.select %30, %28, %31 : vector<16x256xi1>, vector<16x256xf32>
    %33 = arith.addf %24, %32 : vector<16x256xf32>
    %c2_18 = arith.constant 2 : index
    %c0_19 = arith.constant 0 : index
    %c0_20 = arith.constant 0 : index
    %34 = vector.load %arg3[%c2_18, %c0_19, %c0_20] : memref<3x128x256xbf16, #tpu.memory_space<vmem>>, vector<1x128x256xbf16>
    %35 = vector.shape_cast %34 : vector<1x128x256xbf16> to vector<128x256xbf16>
    %cst_21 = arith.constant dense<0.000000e+00> : vector<16x256xf32>
    %36 = tpu.matmul %12, %35, %cst_21 {dimension_numbers = #tpu.dot_dimension_numbers<[1], [0], [0], [1], [0, 0, 1, 1], [], []>} : vector<16x128xbf16>, vector<128x256xbf16>, vector<16x256xf32> -> vector<16x256xf32>
    %c15_i32_22 = arith.constant 15 : i32
    %37 = tpu.dynamic_rotate %36 by %c15_i32_22 dim 0 : vector<16x256xf32>, i32 -> vector<16x256xf32>
    %cst_23 = arith.constant 0.000000e+00 : f32
    %38 = vector.shape_cast %19 : vector<16x1xi1> to vector<16x1xi1>
    %39 = vector.broadcast %38 : vector<16x1xi1> to vector<16x256xi1>
    %40 = vector.broadcast %cst_23 : f32 to vector<16x256xf32>
    %41 = arith.select %39, %37, %40 : vector<16x256xi1>, vector<16x256xf32>
    %42 = arith.addf %33, %41 : vector<16x256xf32>
    %43 = arith.negf %42 : vector<16x256xf32>
    %44 = math.exp %43 : vector<16x256xf32>
    %cst_24 = arith.constant 1.000000e+00 : f32
    %45 = vector.broadcast %cst_24 : f32 to vector<16x256xf32>
    %46 = arith.addf %45, %44 : vector<16x256xf32>
    %47 = arith.divf %45, %46 : vector<16x256xf32>
    %48 = arith.mulf %42, %47 : vector<16x256xf32>
    %49 = arith.truncf %48 : vector<16x256xf32> to vector<16x256xbf16>
    %50 = vector.broadcast %4 : vector<1x256xf32> to vector<16x256xf32>
    %51 = arith.addf %7, %50 : vector<16x256xf32>
    %c1_25 = arith.constant 1 : index
    %c0_26 = arith.constant 0 : index
    %c0_27 = arith.constant 0 : index
    %52 = vector.load %arg4[%c1_25, %c0_26, %c0_27] : memref<3x256x256xbf16, #tpu.memory_space<vmem>>, vector<1x256x256xbf16>
    %53 = vector.shape_cast %52 : vector<1x256x256xbf16> to vector<256x256xbf16>
    %cst_28 = arith.constant dense<0.000000e+00> : vector<16x256xf32>
    %54 = tpu.matmul %49, %53, %cst_28 {dimension_numbers = #tpu.dot_dimension_numbers<[1], [0], [0], [1], [0, 0, 1, 1], [], []>} : vector<16x256xbf16>, vector<256x256xbf16>, vector<16x256xf32> -> vector<16x256xf32>
    %55 = arith.addf %51, %54 : vector<16x256xf32>
    %c0_29 = arith.constant 0 : index
    %c0_30 = arith.constant 0 : index
    %c0_31 = arith.constant 0 : index
    %56 = vector.load %arg4[%c0_29, %c0_30, %c0_31] : memref<3x256x256xbf16, #tpu.memory_space<vmem>>, vector<1x256x256xbf16>
    %57 = vector.shape_cast %56 : vector<1x256x256xbf16> to vector<256x256xbf16>
    %cst_32 = arith.constant dense<0.000000e+00> : vector<16x256xf32>
    %58 = tpu.matmul %49, %57, %cst_32 {dimension_numbers = #tpu.dot_dimension_numbers<[1], [0], [0], [1], [0, 0, 1, 1], [], []>} : vector<16x256xbf16>, vector<256x256xbf16>, vector<16x256xf32> -> vector<16x256xf32>
    %c1_i32_33 = arith.constant 1 : i32
    %59 = tpu.dynamic_rotate %58 by %c1_i32_33 dim 0 : vector<16x256xf32>, i32 -> vector<16x256xf32>
    %cst_34 = arith.constant 0.000000e+00 : f32
    %60 = vector.shape_cast %17 : vector<16x1xi1> to vector<16x1xi1>
    %61 = vector.broadcast %60 : vector<16x1xi1> to vector<16x256xi1>
    %62 = vector.broadcast %cst_34 : f32 to vector<16x256xf32>
    %63 = arith.select %61, %59, %62 : vector<16x256xi1>, vector<16x256xf32>
    %64 = arith.addf %55, %63 : vector<16x256xf32>
    %c2_35 = arith.constant 2 : index
    %c0_36 = arith.constant 0 : index
    %c0_37 = arith.constant 0 : index
    %65 = vector.load %arg4[%c2_35, %c0_36, %c0_37] : memref<3x256x256xbf16, #tpu.memory_space<vmem>>, vector<1x256x256xbf16>
    %66 = vector.shape_cast %65 : vector<1x256x256xbf16> to vector<256x256xbf16>
    %cst_38 = arith.constant dense<0.000000e+00> : vector<16x256xf32>
    %67 = tpu.matmul %49, %66, %cst_38 {dimension_numbers = #tpu.dot_dimension_numbers<[1], [0], [0], [1], [0, 0, 1, 1], [], []>} : vector<16x256xbf16>, vector<256x256xbf16>, vector<16x256xf32> -> vector<16x256xf32>
    %c15_i32_39 = arith.constant 15 : i32
    %68 = tpu.dynamic_rotate %67 by %c15_i32_39 dim 0 : vector<16x256xf32>, i32 -> vector<16x256xf32>
    %cst_40 = arith.constant 0.000000e+00 : f32
    %69 = vector.shape_cast %19 : vector<16x1xi1> to vector<16x1xi1>
    %70 = vector.broadcast %69 : vector<16x1xi1> to vector<16x256xi1>
    %71 = vector.broadcast %cst_40 : f32 to vector<16x256xf32>
    %72 = arith.select %70, %68, %71 : vector<16x256xi1>, vector<16x256xf32>
    %73 = arith.addf %64, %72 : vector<16x256xf32>
    %c0_41 = arith.constant 0 : index
    %c0_42 = arith.constant 0 : index
    %74 = vector.load %arg6[%c0_41, %c0_42] : memref<16x256xf32, #tpu.memory_space<vmem>>, vector<16x256xf32>
    tpu.vector_store %arg6[%c0_41, %c0_42], %73 {strides = array<i32>} : memref<16x256xf32, #tpu.memory_space<vmem>>, vector<16x256xf32>,
    return
  }
  func.func @transform_0(%arg0: i32) -> (i32, i32) {
    %c0_i32 = arith.constant 0 : i32
    %c0_i32_0 = arith.constant 0 : i32
    return %arg0, %c0_i32 : i32, i32
  }
  func.func @transform_1(%arg0: i32) -> (i32, i32) {
    %c0_i32 = arith.constant 0 : i32
    %c0_i32_0 = arith.constant 0 : i32
    %c0_i32_1 = arith.constant 0 : i32
    return %c0_i32, %c0_i32_0 : i32, i32
  }
  func.func @transform_2(%arg0: i32) -> (i32, i32, i32) {
    %c0_i32 = arith.constant 0 : i32
    %c0_i32_0 = arith.constant 0 : i32
    %c0_i32_1 = arith.constant 0 : i32
    %c0_i32_2 = arith.constant 0 : i32
    return %c0_i32, %c0_i32_0, %c0_i32_1 : i32, i32, i32
  }
  func.func @transform_3(%arg0: i32) -> (i32, i32, i32) {
    %c0_i32 = arith.constant 0 : i32
    %c0_i32_0 = arith.constant 0 : i32
    %c0_i32_1 = arith.constant 0 : i32
    %c0_i32_2 = arith.constant 0 : i32
    return %c0_i32, %c0_i32_0, %c0_i32_1 : i32, i32, i32
  }
  func.func @transform_4(%arg0: i32) -> (i32, i32) {
    %c0_i32 = arith.constant 0 : i32
    %c0_i32_0 = arith.constant 0 : i32
    %c0_i32_1 = arith.constant 0 : i32
    return %c0_i32, %c0_i32_0 : i32, i32
  }
  func.func @transform_5(%arg0: i32) -> (i32, i32) {
    %c0_i32 = arith.constant 0 : i32
    %c0_i32_0 = arith.constant 0 : i32
    return %arg0, %c0_i32 : i32, i32
  }
}

</mosaic_0001>

<bundles_post_ra>
// kernel: tile.21
= control target key start
LH: loop header
LB: loop body
LE: loop exit
PB: predicated region body
PF: predicated region fallthrough
CT: control target
= control target key end

     0   :  { %s28_s0 = inlined_call_operand.vmem [shape: f32[8], index: 0, kind: input, shape index: {}]   ;;  %s29_s1 = inlined_call_operand.vmem [shape: f32[16,8], index: 1, kind: output, shape index: {}]  }
   0x1   :  { %v4_v0 = vld [vmem:[%s28_s0] ss:$0 sm:$0xff] }
   0x2   :  { %5 = vst [vmem:[%s29_s1] sm:$0xff] %v4_v0  ;;  %8 = vst [vmem:[%s29_s1 + $0x8] sm:$0xff] %v4_v0 }

// kernel: tile.30
= control target key start
LH: loop header
LB: loop body
LE: loop exit
PB: predicated region body
PF: predicated region fallthrough
CT: control target
= control target key end

     0   :  { %2 = vsyncpa [#allocation1], 0  ;;  %s47_s6 = smov [#allocation0]   ;;  %s76_s0 = inlined_call_operand.hbm [shape: f32[16], index: 0, kind: input, shape index: {}]   ;;  %s77_s1 = inlined_call_operand.vmem [shape: f32[16,16], index: 1, kind: output, shape index: {}]  }
   0x1   :  { %s9_s7 = sshll.u32 %s47_s6, 4  ;;  %s23_s10 = scalar_lea.hbm %s76_s0, 16  ;;  %s10_s7 = int_to_ptr.vmem [resolvable:$true] %s9_s7 }
   0x2   :  { %p24_p0 = scmp.ne.s32.totalorder %s76_s0, %s23_s10  ;;  %p27_p1 = scmp.lt.u32.totalorder %s23_s10, %s76_s0 }
   0x4   :  { %p29_p2 = pnand %p27_p1, %p24_p0 }
   0x6   :  { %32 = shalt.err (!%p29_p2)
}
   0x7   :  { %s33_s15 = scalar_lea.vmem %s10_s7, 16  ;;  %s37_s16 = scalar_lea.vmem %s10_s7, 32 }
   0x8   :  { %p34_p3 = scmp.ne.s32.totalorder %s10_s7, %s33_s15  ;;  %p38_p4 = scmp.lt.s32.totalorder %s10_s7, %s10_s7 }
   0x9   :  { %p39_p5 = scmp.lt.s32.totalorder %s37_s16, %s33_s15 }
   0xb   :  { %p40_p6 = por %p39_p5, %p38_p4 }
   0xd   :  { %p41_p7 = pnand %p40_p6, %p34_p3 }
   0xf   :  { %44 = shalt.err (!%p41_p7)
}
  0x10   :  { %12 = dma.hbm_to_vmem [thread:$0]  %s76_s0, 16, %s10_s7, [#allocation1]  }
  0x11   :  { %45 = dma.done.wait [#allocation1], 16  }
  0x12   :  { %46 = vsyncadd [#allocation1], 4294967280  ;;  %v16_v0 = vld [vmem:[#allocation0] ss:$0 sm:$0xff] }
  0x13   :  { %17 = vst [vmem:[%s77_s1] sm:$0xff] %v16_v0  ;;  %21 = vst [vmem:[%s77_s1 + $0x8] sm:$0xff] %v16_v0 }
  0x14   :  { %20 = vsyncpa [#allocation1], 1 }

// kernel: tile.34
= control target key start
LH: loop header
LB: loop body
LE: loop exit
PB: predicated region body
PF: predicated region fallthrough
CT: control target
= control target key end

     0   :  { %s28_s0 = inlined_call_operand.vmem [shape: f32[16], index: 0, kind: input, shape index: {}]   ;;  %s29_s1 = inlined_call_operand.vmem [shape: f32[16,16], index: 1, kind: output, shape index: {}]  }
   0x1   :  { %v4_v0 = vld [vmem:[%s28_s0] ss:$0 sm:$0xff] }
   0x2   :  { %5 = vst [vmem:[%s29_s1] sm:$0xff] %v4_v0  ;;  %8 = vst [vmem:[%s29_s1 + $0x8] sm:$0xff] %v4_v0 }

// kernel: residual_block.1
= control target key start
LH: loop header
LB: loop body
LE: loop exit
PB: predicated region body
PF: predicated region fallthrough
CT: control target
= control target key end

     0   :  { %s2312_s18 = smov 0   ;;  %s2914_s0 = inlined_call_operand.vmem [shape: f32[32,128], index: 0, kind: input, shape index: {}]   ;;  %s2915_s1 = inlined_call_operand.vmem [shape: f32[4,256], index: 1, kind: input, shape index: {}]   ;;  %s2916_s2 = inlined_call_operand.vmem [shape: bf16[3,128,256], index: 2, kind: input, shape index: {}]   ;;  %s2917_s3 = inlined_call_operand.vmem [shape: bf16[3,256,256], index: 3, kind: input, shape index: {}]   ;;  %s2918_s4 = inlined_call_operand.vmem [shape: bf16[128,256], index: 4, kind: input, shape index: {}]   ;;  %s2919_s5 = inlined_call_operand.vmem [shape: f32[32,256], index: 5, kind: output, shape index: {}]  }
   0x1 LB: > { %s1723_s19 = sadd.s32 4294967295, %s2279_s18   ;;  %p1727_p0 = scmp.ge.s32.totalorder %s2279_s18, 1  ;;  %s2279_s18 = sphi %s2312_s18, %s15_s18  }
   0x2   : > { %p188_p1 = scmp.lt.s32.totalorder %s2279_s18, 3 }
   0x4   : > { %p189_p2 = pnand %p1727_p0, %p188_p1 }
   0x5   : > { %v2017_v0 = vld [vmem:[%s2916_s2 + $0x84] ss:$8 sps:$4 sm:$0xff] (!%p189_p2)   ;;  %v2019_v1 = vld [vmem:[%s2916_s2 + $0x80] ss:$8 sps:$4 sm:$0xff] (!%p189_p2)   ;;  %v2281_v2 = vmov (!%p189_p2), 0   ;;  %s1728_s26 = sshll.u32 (!%p189_p2), %s1723_s19, 1 }
   0x6   : > { %192 = sbr.rel (%p189_p2) target bundleno = 612 (0x264), region = 40  ;;  %407 = vmatprep.mubr.bf16.mxu1 (!%p189_p2), %v2281_v2  ;;  %722 = vmatprep.mubr.bf16.mxu0 (!%p189_p2), %v2281_v2  ;;  %v2020_v3 = vld [vmem:[%s2916_s2 + $0x94] ss:$8 sps:$4 sm:$0xff] (!%p189_p2)   ;;  %v2022_v4 = vld [vmem:[%s2916_s2 + $0x90] ss:$8 sps:$4 sm:$0xff] (!%p189_p2)   ;;  %p218_p3 = scmp.lt.s32.totalorder (!%p189_p2), %s1728_s26, 3 }
   0x7   : > { %375 = vmatprep.subr.bf16.mxu1 (!%p189_p2), %v2017_v0  ;;  %v2023_v5 = vld [vmem:[%s2916_s2 + $0xa4] ss:$8 sps:$4 sm:$0xff] (!%p189_p2)   ;;  %v2025_v6 = vld [vmem:[%s2916_s2 + $0xa0] ss:$8 sps:$4 sm:$0xff] (!%p189_p2)   ;;  %v2026_v7 = vld [vmem:[%s2916_s2 + $0xb4] ss:$8 sps:$4 sm:$0xff] (!%p189_p2)  }
   0x8   : > { %376 = vmatpush1.bf16.msra.mxu1 (!%p189_p2), %v2019_v1  ;;  %v2028_v8 = vld [vmem:[%s2916_s2 + $0xb0] ss:$8 sps:$4 sm:$0xff] (!%p189_p2)   ;;  %v2041_v9 = vld [vmem:[%s2916_s2 + $0x104] ss:$8 sps:$4 sm:$0xff] (!%p189_p2)   ;;  %v2031_v11 = vld [vmem:[%s2916_s2 + $0xc0] ss:$8 sps:$4 sm:$0xff] (!%p189_p2)  }
   0x9   : > { %377 = vmatprep.subr.bf16.mxu1 (!%p189_p2), %v2020_v3  ;;  %v2029_v10 = vld [vmem:[%s2916_s2 + $0xc4] ss:$8 sps:$4 sm:$0xff] (!%p189_p2)   ;;  %690 = vmatprep.subr.bf16.mxu0 (!%p189_p2), %v2041_v9  ;;  %v2046_v12 = vld [vmem:[%s2916_s2 + $0x100] ss:$8 sps:$4 sm:$0xff] (!%p189_p2)   ;;  %v2047_v13 = vld [vmem:[%s2916_s2 + $0x114] ss:$8 sps:$4 sm:$0xff] (!%p189_p2)  }
   0xa   : > { %v2032_v14 = vld [vmem:[%s2916_s2 + $0xd4] ss:$8 sps:$4 sm:$0xff] (!%p189_p2)   ;;  %691 = vmatpush1.bf16.msra.mxu0 (!%p189_p2), %v2046_v12  ;;  %v2034_v15 = vld [vmem:[%s2916_s2 + $0xd0] ss:$8 sps:$4 sm:$0xff] (!%p189_p2)   ;;  %v2035_v17 = vld [vmem:[%s2916_s2 + $0xe4] ss:$8 sps:$4 sm:$0xff] (!%p189_p2)  }
   0xb   : > { %692 = vmatprep.subr.bf16.mxu0 (!%p189_p2), %v2047_v13  ;;  %v2052_v16 = vld [vmem:[%s2916_s2 + $0x110] ss:$8 sps:$4 sm:$0xff] (!%p189_p2)   ;;  %v2053_v18 = vld [vmem:[%s2916_s2 + $0x124] ss:$8 sps:$4 sm:$0xff] (!%p189_p2)   ;;  %v1735_v21 = vld [vmem:[%s2915_s1] ss:$0 sm:$0xff] (!%p189_p2) }
   0xc   : > { %378 = vmatpush1.bf16.msra.mxu1 (!%p189_p2), %v2022_v4  ;;  %v2058_v22 = vld [vmem:[%s2916_s2 + $0x120] ss:$8 sps:$4 sm:$0xff] (!%p189_p2)   ;;  %v2059_v23 = vld [vmem:[%s2916_s2 + $0x134] ss:$8 sps:$4 sm:$0xff] (!%p189_p2)   ;;  %v2064_v29 = vld [vmem:[%s2916_s2 + $0x130] ss:$8 sps:$4 sm:$0xff] (!%p189_p2)  }
   0xd   : > { %379 = vmatprep.subr.bf16.mxu1 %v2023_v5  ;;  %s2925_s26 = smov (!%p218_p3, %s1728_s26), 3  ;;  %v2037_v24 = vld [vmem:[%s2916_s2 + $0xe0] ss:$8 sps:$4 sm:$0xff]   ;;  %v2038_v28 = vld [vmem:[%s2916_s2 + $0xf4] ss:$8 sps:$4 sm:$0xff]  }
   0xe   : > { %s1729_s16 = sshll.u32 %s2925_s26, 3  ;;  %693 = vmatpush1.bf16.msra.mxu0 %v2052_v16  ;;  %v1736_v27 = vld [vmem:[%s2915_s1 + $0x1] ss:$0 sm:$0xff]  ;;  %v2065_v30 = vld [vmem:[%s2916_s2 + $0x144] ss:$8 sps:$4 sm:$0xff]   ;;  %s1999_s6 = sshll.u32 %s2925_s26, 4 }
   0xf   : > { %s221_s29 = scalar_lea.vmem %s2914_s0, %s1729_s16  ;;  %694 = vmatprep.subr.bf16.mxu0 %v2053_v18  ;;  %v2040_v33 = vld [vmem:[%s2916_s2 + $0xf0] ss:$8 sps:$4 sm:$0xff]   ;;  %v2045_v34 = vld [vmem:[%s2916_s2 + $0x4] ss:$8 sps:$4 sm:$0xff]   ;;  %v2070_v35 = vld [vmem:[%s2916_s2 + $0x140] ss:$8 sps:$4 sm:$0xff]   ;;  %s228_s9 = scalar_lea.vmem %s2919_s5, %s1999_s6 }
  0x10   : > { %380 = vmatpush1.bf16.msra.mxu1 %v2025_v6  ;;  %v2382_v19 = vld [vmem:[%s221_s29] sm:$0xff]  ;;  %v2384_v20 = vld [vmem:[%s221_s29 + $0x8] sm:$0xff]  ;;  %v2071_v36 = vld [vmem:[%s2916_s2 + $0x154] ss:$8 sps:$4 sm:$0xff]  }
  0x11   : > { %381 = vmatprep.subr.bf16.mxu1 %v2026_v7  ;;  %v260_v25 = vsub.f32 %v2382_v19, %v1735_v21  ;;  %v261_v26 = vsub.f32 %v2384_v20, %v1735_v21  ;;  %v2043_v38 = vld [vmem:[%s2916_s2] ss:$8 sps:$4 sm:$0xff]   ;;  %v2051_v39 = vld [vmem:[%s2916_s2 + $0x14] ss:$8 sps:$4 sm:$0xff]   ;;  %v2076_v40 = vld [vmem:[%s2916_s2 + $0x150] ss:$8 sps:$4 sm:$0xff]  }
  0x12   : > { %695 = vmatpush1.bf16.msra.mxu0 %v2058_v22  ;;  %v2077_v41 = vld [vmem:[%s2916_s2 + $0x164] ss:$8 sps:$4 sm:$0xff]   ;;  %v2049_v42 = vld [vmem:[%s2916_s2 + $0x10] ss:$8 sps:$4 sm:$0xff]   ;;  %v2082_v44 = vld [vmem:[%s2916_s2 + $0x160] ss:$8 sps:$4 sm:$0xff]  }
  0x13   : > { %696 = vmatprep.subr.bf16.mxu0 %v2059_v23  ;;  %v266_v31 = vmul.f32 %v1736_v27, %v260_v25  ;;  %v267_v32 = vmul.f32 %v1736_v27, %v261_v26  ;;  %v2057_v43 = vld [vmem:[%s2916_s2 + $0x24] ss:$8 sps:$4 sm:$0xff]   ;;  %v2083_v45 = vld [vmem:[%s2916_s2 + $0x174] ss:$8 sps:$4 sm:$0xff]   ;;  %v2055_v46 = vld [vmem:[%s2916_s2 + $0x20] ss:$8 sps:$4 sm:$0xff]  }
  0x14   : > { %382 = vmatpush1.bf16.msra.mxu1 %v2028_v8  ;;  %v2063_v47 = vld [vmem:[%s2916_s2 + $0x34] ss:$8 sps:$4 sm:$0xff]   ;;  %v2088_v48 = vld [vmem:[%s2916_s2 + $0x170] ss:$8 sps:$4 sm:$0xff]   ;;  %v2069_v50 = vld [vmem:[%s2916_s2 + $0x44] ss:$8 sps:$4 sm:$0xff]  }
  0x15   : > { %383 = vmatprep.subr.bf16.mxu1 %v2029_v10  ;;  %v268_v37 = vpack.c.bf16 %v267_v32, %v266_v31  ;;  %v2061_v49 = vld [vmem:[%s2916_s2 + $0x30] ss:$8 sps:$4 sm:$0xff]   ;;  %v2067_v51 = vld [vmem:[%s2916_s2 + $0x40] ss:$8 sps:$4 sm:$0xff]   ;;  %v2075_v52 = vld [vmem:[%s2916_s2 + $0x54] ss:$8 sps:$4 sm:$0xff]  }
  0x16   : > { %697 = vmatpush1.bf16.msra.mxu0 %v2064_v29  ;;  %v2073_v53 = vld [vmem:[%s2916_s2 + $0x50] ss:$8 sps:$4 sm:$0xff]   ;;  %v2081_v54 = vld [vmem:[%s2916_s2 + $0x64] ss:$8 sps:$4 sm:$0xff]   ;;  %v2079_v55 = vld [vmem:[%s2916_s2 + $0x60] ss:$8 sps:$4 sm:$0xff]  }
  0x17   : > { %698 = vmatprep.subr.bf16.mxu0 %v2065_v30  ;;  %v2087_v56 = vld [vmem:[%s2916_s2 + $0x74] ss:$8 sps:$4 sm:$0xff]   ;;  %v2085_v57 = vld [vmem:[%s2916_s2 + $0x70] ss:$8 sps:$4 sm:$0xff]   ;;  %v2091_v58 = vld [vmem:[%s2918_s4 + $0x4] ss:$8 sps:$4 sm:$0xff]  }
  0x18   : > { %384 = vmatpush1.bf16.msra.mxu1 %v2031_v11  ;;  %v2089_v59 = vld [vmem:[%s2918_s4] ss:$8 sps:$4 sm:$0xff]   ;;  %v2094_v60 = vld [vmem:[%s2918_s4 + $0x14] ss:$8 sps:$4 sm:$0xff]   ;;  %v2092_v61 = vld [vmem:[%s2918_s4 + $0x10] ss:$8 sps:$4 sm:$0xff]  }
  0x19   : > { %385 = vmatprep.subr.bf16.mxu1 %v2032_v14  ;;  %v2097_v62 = vld [vmem:[%s2918_s4 + $0x24] ss:$8 sps:$4 sm:$0xff]   ;;  %v2095_v63 = vld [vmem:[%s2918_s4 + $0x20] ss:$8 sps:$4 sm:$0xff]   ;;  %v2100_v0 = vld [vmem:[%s2918_s4 + $0x34] ss:$8 sps:$4 sm:$0xff]   ;;  %v239_v14 = vpack.c.bf16 %v2384_v20, %v2382_v19 }
  0x1a   : > { %699 = vmatpush1.bf16.msra.mxu0 %v2070_v35  ;;  %v2098_v1 = vld [vmem:[%s2918_s4 + $0x30] ss:$8 sps:$4 sm:$0xff]   ;;  %v2101_v3 = vld [vmem:[%s2918_s4 + $0x40] ss:$8 sps:$4 sm:$0xff]   ;;  %v2106_v4 = vld [vmem:[%s2918_s4 + $0x54] ss:$8 sps:$4 sm:$0xff]  }
  0x1b   : > { %700 = vmatprep.subr.bf16.mxu0 %v2071_v36  ;;  %v2104_v5 = vld [vmem:[%s2918_s4 + $0x50] ss:$8 sps:$4 sm:$0xff]   ;;  %v2109_v6 = vld [vmem:[%s2918_s4 + $0x64] ss:$8 sps:$4 sm:$0xff]   ;;  %v2107_v7 = vld [vmem:[%s2918_s4 + $0x60] ss:$8 sps:$4 sm:$0xff]  }
  0x1c   : > { %386 = vmatpush1.bf16.msra.mxu1 %v2034_v15  ;;  %v2110_v8 = vld [vmem:[%s2918_s4 + $0x70] ss:$8 sps:$4 sm:$0xff]   ;;  %v2112_v9 = vld [vmem:[%s2918_s4 + $0x74] ss:$8 sps:$4 sm:$0xff]   ;;  %v2113_v10 = vld [vmem:[%s2917_s3] ss:$8 sps:$4 sm:$0xff]  }
  0x1d   : > { %387 = vmatprep.subr.bf16.mxu1 %v2035_v17  ;;  %v2115_v11 = vld [vmem:[%s2917_s3 + $0x4] ss:$8 sps:$4 sm:$0xff]   ;;  %v2121_v13 = vld [vmem:[%s2917_s3 + $0x14] ss:$8 sps:$4 sm:$0xff]   ;;  %v2116_v15 = vld [vmem:[%s2917_s3 + $0x100] ss:$8 sps:$4 sm:$0xff]  }
  0x1e   : > { %701 = vmatpush1.bf16.msra.mxu0 %v2076_v40  ;;  %v2118_v12 = vld [vmem:[%s2917_s3 + $0x104] ss:$8 sps:$4 sm:$0xff]   ;;  %v2119_v16 = vld [vmem:[%s2917_s3 + $0x10] ss:$8 sps:$4 sm:$0xff]   ;;  %v2124_v17 = vld [vmem:[%s2917_s3 + $0x114] ss:$8 sps:$4 sm:$0xff]  }
  0x1f   : > { %702 = vmatprep.subr.bf16.mxu0 %v2077_v41  ;;  %v2127_v18 = vld [vmem:[%s2917_s3 + $0x24] ss:$8 sps:$4 sm:$0xff]   ;;  %v2122_v19 = vld [vmem:[%s2917_s3 + $0x110] ss:$8 sps:$4 sm:$0xff]   ;;  %v2125_v20 = vld [vmem:[%s2917_s3 + $0x20] ss:$8 sps:$4 sm:$0xff]  }
  0x20   : > { %388 = vmatpush1.bf16.msra.mxu1 %v2037_v24  ;;  %v2130_v21 = vld [vmem:[%s2917_s3 + $0x124] ss:$8 sps:$4 sm:$0xff]   ;;  %v2133_v22 = vld [vmem:[%s2917_s3 + $0x34] ss:$8 sps:$4 sm:$0xff]   ;;  %v2128_v23 = vld [vmem:[%s2917_s3 + $0x120] ss:$8 sps:$4 sm:$0xff]  }
  0x21   : > { %389 = vmatprep.subr.bf16.mxu1 %v2038_v28  ;;  %v2131_v24 = vld [vmem:[%s2917_s3 + $0x30] ss:$8 sps:$4 sm:$0xff]   ;;  %v2136_v25 = vld [vmem:[%s2917_s3 + $0x134] ss:$8 sps:$4 sm:$0xff]   ;;  %v2139_v26 = vld [vmem:[%s2917_s3 + $0x44] ss:$8 sps:$4 sm:$0xff]  }
  0x22   : > { %703 = vmatpush1.bf16.msra.mxu0 %v2082_v44  ;;  %v2134_v27 = vld [vmem:[%s2917_s3 + $0x130] ss:$8 sps:$4 sm:$0xff]   ;;  %v2137_v28 = vld [vmem:[%s2917_s3 + $0x40] ss:$8 sps:$4 sm:$0xff]   ;;  %v2142_v29 = vld [vmem:[%s2917_s3 + $0x144] ss:$8 sps:$4 sm:$0xff]  }
  0x23   : > { %704 = vmatprep.subr.bf16.mxu0 %v2083_v45  ;;  %v2145_v30 = vld [vmem:[%s2917_s3 + $0x54] ss:$8 sps:$4 sm:$0xff]   ;;  %v2140_v31 = vld [vmem:[%s2917_s3 + $0x140] ss:$8 sps:$4 sm:$0xff]   ;;  %v2143_v32 = vld [vmem:[%s2917_s3 + $0x50] ss:$8 sps:$4 sm:$0xff]  }
  0x24   : > { %390 = vmatpush1.bf16.msra.mxu1 %v2040_v33  ;;  %v2148_v33 = vld [vmem:[%s2917_s3 + $0x154] ss:$8 sps:$4 sm:$0xff]   ;;  %v2151_v35 = vld [vmem:[%s2917_s3 + $0x64] ss:$8 sps:$4 sm:$0xff]   ;;  %v2149_v36 = vld [vmem:[%s2917_s3 + $0x60] ss:$8 sps:$4 sm:$0xff]  }
  0x25   : > { %529 = vmatprep.subr.bf16.mxu1 %v2045_v34  ;;  %v2146_v34 = vld [vmem:[%s2917_s3 + $0x150] ss:$8 sps:$4 sm:$0xff]   ;;  %v2160_v41 = vld [vmem:[%s2917_s3 + $0x174] ss:$8 sps:$4 sm:$0xff]   ;;  %v2161_v44 = vld [vmem:[%s2917_s3 + $0x80] ss:$8 sps:$4 sm:$0xff]  }
  0x26   : > { %705 = vmatpush1.bf16.msra.mxu0 %v2088_v48  ;;  %v2155_v40 = vld [vmem:[%s2917_s3 + $0x70] ss:$8 sps:$4 sm:$0xff]   ;;  %v2166_v45 = vld [vmem:[%s2917_s3 + $0x184] ss:$8 sps:$4 sm:$0xff]  }
  0x27   : > { %408 = vmatmul.mubr.bf16.vlgmr.msra.gmra.mrb[0].mxu1 %v268_v37  ;;  %1350 = vmatprep.subr.bf16.mxu0 %v2115_v11  ;;  %v2167_v48 = vld [vmem:[%s2917_s3 + $0x90] ss:$8 sps:$4 sm:$0xff]   ;;  %v2211_v11 = vld [vmem:[%s2917_s3 + $0x204] ss:$8 sps:$4 sm:$0xff]  }
  0x28   : > { %530 = vmatpush1.bf16.msra.mxu1 %v2043_v38  ;;  %561 = vmatprep.mubr.bf16.mxu1 %v2281_v2  ;;  %v2152_v38 = vld [vmem:[%s2917_s3 + $0x160] ss:$8 sps:$4 sm:$0xff]  }
  0x29   : > { %531 = vmatprep.subr.bf16.mxu1 %v2051_v39  ;;  %723 = vmatmul.mubr.bf16.vlgmr.msra.gmra.mrb[0].mxu0 %v268_v37  ;;  %v2157_v39 = vld [vmem:[%s2917_s3 + $0x74] ss:$8 sps:$4 sm:$0xff]  }
  0x2a   : > { %1351 = vmatpush1.bf16.msra.mxu0 %v2113_v10  ;;  %v2206_v10 = vld [vmem:[%s2917_s3 + $0x1f0] ss:$8 sps:$4 sm:$0xff]  }
  0x2b   : > { %1352 = vmatprep.subr.bf16.mxu0 %v2121_v13 }
  0x2c   : > { %532 = vmatpush1.bf16.msra.mxu1 %v2049_v42  ;;  %v2158_v42 = vld [vmem:[%s2917_s3 + $0x170] ss:$8 sps:$4 sm:$0xff]  }
  0x2d   : > { %533 = vmatprep.subr.bf16.mxu1 %v2057_v43  ;;  %v2163_v43 = vld [vmem:[%s2917_s3 + $0x84] ss:$8 sps:$4 sm:$0xff]  }
  0x2e   : > { %1353 = vmatpush1.bf16.msra.mxu0 %v2119_v16  ;;  %v269_v16 = vlaneseq }
  0x2f   : > { %1354 = vmatprep.subr.bf16.mxu0 %v2127_v18 }
  0x30   : > { %534 = vmatpush1.bf16.msra.mxu1 %v2055_v46  ;;  %v2164_v46 = vld [vmem:[%s2917_s3 + $0x180] ss:$8 sps:$4 sm:$0xff]  }
  0x31   : > { %535 = vmatprep.subr.bf16.mxu1 %v2063_v47  ;;  %v2169_v47 = vld [vmem:[%s2917_s3 + $0x94] ss:$8 sps:$4 sm:$0xff]  }
  0x32   : > { %1355 = vmatpush1.bf16.msra.mxu0 %v2125_v20 }
  0x33   : > { %1356 = vmatprep.subr.bf16.mxu0 %v2133_v22 }
  0x34   : > { %536 = vmatpush1.bf16.msra.mxu1 %v2061_v49  ;;  %v2172_v49 = vld [vmem:[%s2917_s3 + $0x194] ss:$8 sps:$4 sm:$0xff]  }
  0x35   : > { %537 = vmatprep.subr.bf16.mxu1 %v2069_v50  ;;  %v2170_v50 = vld [vmem:[%s2917_s3 + $0x190] ss:$8 sps:$4 sm:$0xff]  }
  0x36   : > { %1357 = vmatpush1.bf16.msra.mxu0 %v2131_v24 }
  0x37   : > { %1358 = vmatprep.subr.bf16.mxu0 %v2139_v26 }
  0x38   : > { %538 = vmatpush1.bf16.msra.mxu1 %v2067_v51  ;;  %v2175_v51 = vld [vmem:[%s2917_s3 + $0xa4] ss:$8 sps:$4 sm:$0xff]  }
  0x39   : > { %539 = vmatprep.subr.bf16.mxu1 %v2075_v52  ;;  %v2173_v52 = vld [vmem:[%s2917_s3 + $0xa0] ss:$8 sps:$4 sm:$0xff]  }
  0x3a   : > { %1359 = vmatpush1.bf16.msra.mxu0 %v2137_v28 }
  0x3b   : > { %1360 = vmatprep.subr.bf16.mxu0 %v2145_v30 }
  0x3c   : > { %540 = vmatpush1.bf16.msra.mxu1 %v2073_v53  ;;  %v2178_v53 = vld [vmem:[%s2917_s3 + $0x1a4] ss:$8 sps:$4 sm:$0xff]  }
  0x3d   : > { %541 = vmatprep.subr.bf16.mxu1 %v2081_v54  ;;  %v2176_v54 = vld [vmem:[%s2917_s3 + $0x1a0] ss:$8 sps:$4 sm:$0xff]  }
  0x3e   : > { %1361 = vmatpush1.bf16.msra.mxu0 %v2143_v32  ;;  %v1733_v32 = vld [vmem:[%s2915_s1 + $0x2] ss:$4 sm:$0x3] }
  0x3f   : > { %1362 = vmatprep.subr.bf16.mxu0 %v2151_v35 }
  0x40   : > { %542 = vmatpush1.bf16.msra.mxu1 %v2079_v55  ;;  %v2181_v55 = vld [vmem:[%s2917_s3 + $0xb4] ss:$8 sps:$4 sm:$0xff]  }
  0x41   : > { %543 = vmatprep.subr.bf16.mxu1 %v2087_v56  ;;  %v2179_v56 = vld [vmem:[%s2917_s3 + $0xb0] ss:$8 sps:$4 sm:$0xff]  }
  0x42   : > { %1363 = vmatpush1.bf16.msra.mxu0 %v2149_v36 }
  0x43   : > { %1364 = vmatprep.subr.bf16.mxu0 %v2157_v39 }
  0x44   : > { %544 = vmatpush1.bf16.msra.mxu1 %v2085_v57  ;;  %v2184_v57 = vld [vmem:[%s2917_s3 + $0x1b4] ss:$8 sps:$4 sm:$0xff]  }
  0x45   : > { %875 = vmatprep.subr.bf16.mxu1 %v2091_v58  ;;  %v2182_v58 = vld [vmem:[%s2917_s3 + $0x1b0] ss:$8 sps:$4 sm:$0xff]  }
  0x46   : > { %1365 = vmatpush1.bf16.msra.mxu0 %v2155_v40 }
  0x47   : > { %562 = vmatmul.mubr.bf16.vlgmr.msra.gmra.mrb[4].mxu1 %v268_v37  ;;  %v2154_v37 = vld [vmem:[%s2917_s3 + $0x164] ss:$8 sps:$4 sm:$0xff]   ;;  %1366 = vmatprep.subr.bf16.mxu0 %v2163_v43 }
  0x48   : > { %876 = vmatpush1.bf16.msra.mxu1 %v2089_v59  ;;  %907 = vmatprep.mubr.bf16.mxu1 %v2281_v2  ;;  %v2103_v2 = vld [vmem:[%s2918_s4 + $0x44] ss:$8 sps:$4 sm:$0xff]  }
  0x49   : > { %877 = vmatprep.subr.bf16.mxu1 %v2094_v60  ;;  %v2187_v59 = vld [vmem:[%s2917_s3 + $0xc4] ss:$8 sps:$4 sm:$0xff]   ;;  %v2185_v60 = vld [vmem:[%s2917_s3 + $0xc0] ss:$8 sps:$4 sm:$0xff]  }
  0x4a   : > { %1367 = vmatpush1.bf16.msra.mxu0 %v2161_v44 }
  0x4b   : > { %1368 = vmatprep.subr.bf16.mxu0 %v2169_v47 }
  0x4c   : > { %878 = vmatpush1.bf16.msra.mxu1 %v2092_v61  ;;  %v2190_v61 = vld [vmem:[%s2917_s3 + $0x1c4] ss:$8 sps:$4 sm:$0xff]  }
  0x4d   : > { %879 = vmatprep.subr.bf16.mxu1 %v2097_v62  ;;  %v2188_v62 = vld [vmem:[%s2917_s3 + $0x1c0] ss:$8 sps:$4 sm:$0xff]  }
  0x4e   : > { %1369 = vmatpush1.bf16.msra.mxu0 %v2167_v48 }
  0x4f   : > { %1370 = vmatprep.subr.bf16.mxu0 %v2175_v51 }
  0x50   : > { %880 = vmatpush1.bf16.msra.mxu1 %v2095_v63  ;;  %v2193_v63 = vld [vmem:[%s2917_s3 + $0xd4] ss:$8 sps:$4 sm:$0xff]  }
  0x51   : > { %881 = vmatprep.subr.bf16.mxu1 %v2100_v0  ;;  %v2191_v0 = vld [vmem:[%s2917_s3 + $0xd0] ss:$8 sps:$4 sm:$0xff]  }
  0x52   : > { %1371 = vmatpush1.bf16.msra.mxu0 %v2173_v52 }
  0x53   : > { %1372 = vmatprep.subr.bf16.mxu0 %v2181_v55 }
  0x54   : > { %882 = vmatpush1.bf16.msra.mxu1 %v2098_v1  ;;  %v2196_v1 = vld [vmem:[%s2917_s3 + $0x1d4] ss:$8 sps:$4 sm:$0xff]  }
  0x55   : > { %883 = vmatprep.subr.bf16.mxu1 %v2103_v2  ;;  %v2194_v2 = vld [vmem:[%s2917_s3 + $0x1d0] ss:$8 sps:$4 sm:$0xff]  }
  0x56   : > { %1373 = vmatpush1.bf16.msra.mxu0 %v2179_v56 }
  0x57   : > { %1374 = vmatprep.subr.bf16.mxu0 %v2187_v59 }
  0x58   : > { %884 = vmatpush1.bf16.msra.mxu1 %v2101_v3  ;;  %v2199_v3 = vld [vmem:[%s2917_s3 + $0xe4] ss:$8 sps:$4 sm:$0xff]  }
  0x59   : > { %885 = vmatprep.subr.bf16.mxu1 %v2106_v4  ;;  %v2202_v4 = vld [vmem:[%s2917_s3 + $0x1e4] ss:$8 sps:$4 sm:$0xff]  }
  0x5a   : > { %1375 = vmatpush1.bf16.msra.mxu0 %v2185_v60 }
  0x5b   : > { %1376 = vmatprep.subr.bf16.mxu0 %v2193_v63 }
  0x5c   : > { %886 = vmatpush1.bf16.msra.mxu1 %v2104_v5  ;;  %v2197_v5 = vld [vmem:[%s2917_s3 + $0xe0] ss:$8 sps:$4 sm:$0xff]  }
  0x5d   : > { %887 = vmatprep.subr.bf16.mxu1 %v2109_v6  ;;  %v2200_v6 = vld [vmem:[%s2917_s3 + $0x1e0] ss:$8 sps:$4 sm:$0xff]  }
  0x5e   : > { %1377 = vmatpush1.bf16.msra.mxu0 %v2191_v0 }
  0x5f   : > { %1378 = vmatprep.subr.bf16.mxu0 %v2199_v3 }
  0x60   : > { %888 = vmatpush1.bf16.msra.mxu1 %v2107_v7  ;;  %v2205_v7 = vld [vmem:[%s2917_s3 + $0xf4] ss:$8 sps:$4 sm:$0xff]  }
  0x61   : > { %889 = vmatprep.subr.bf16.mxu1 %v2112_v9  ;;  %v2203_v9 = vld [vmem:[%s2917_s3 + $0xf0] ss:$8 sps:$4 sm:$0xff]  }
  0x62   : > { %1379 = vmatpush1.bf16.msra.mxu0 %v2197_v5 }
  0x63   : > { %1380 = vmatprep.subr.bf16.mxu0 %v2205_v7 }
  0x64   : > { %890 = vmatpush1.bf16.msra.mxu1 %v2110_v8  ;;  %v2208_v8 = vld [vmem:[%s2917_s3 + $0x1f4] ss:$8 sps:$4 sm:$0xff]  }
  0x65   : > { %1111 = vmatprep.subr.bf16.mxu1 %v2118_v12 }
  0x66   : > { %1381 = vmatpush1.bf16.msra.mxu0 %v2203_v9 }
  0x67   : > { %908 = vmatmul.mubr.bf16.vlgmr.msra.gmra.mrb[8].mxu1 %v239_v14  ;;  %1602 = vmatprep.subr.bf16.mxu0 %v2211_v11 }
  0x68   : > { %1112 = vmatpush1.bf16.msra.mxu1 %v2116_v15 }
  0x69   : > { %1113 = vmatprep.subr.bf16.mxu1 %v2124_v17  ;;  %v2731_v17 = vshrl.u32 %v269_v16, 7 }
  0x6b   : > { %vm737_vm0 = vcmp.lt.s32.totalorder %v2731_v17, 7  ;;  %v271_v30 = vadd.s32 8, %v2731_v17  ;;  %v272_v36 = vand.u32 15, %v2731_v17  ;;  %vm576_vm2 = vcmp.lt.s32.totalorder %v2731_v17, 1 }
  0x6c   : > { %1114 = vmatpush1.bf16.msra.mxu1 %v2122_v19 }
  0x6d   : > { %1115 = vmatprep.subr.bf16.mxu1 %v2130_v21  ;;  %vm2758_vm3 = vcmp.ge.s32.totalorder %v272_v36, 1  ;;  %v2223_v36 = vld [vmem:[%s2917_s3 + $0x244] ss:$8 sps:$4 sm:$0xff]  }
  0x70   : > { %1116 = vmatpush1.bf16.msra.mxu1 %v2128_v23 }
  0x71   : > { %1117 = vmatprep.subr.bf16.mxu1 %v2136_v25 }
  0x74   : > { %1118 = vmatpush1.bf16.msra.mxu1 %v2134_v27 }
  0x75   : > { %1119 = vmatprep.subr.bf16.mxu1 %v2142_v29 }
  0x78   : > { %1120 = vmatpush1.bf16.msra.mxu1 %v2140_v31  ;;  %v421_v31 = vsub.s32 0, %v2731_v17 }
  0x79   : > { %1121 = vmatprep.subr.bf16.mxu1 %v2148_v33  ;;  %v425_v33 = vsub.s32 1, %v2731_v17 }
  0x7a   : > { %v422_v35 = vrot.slane %v1733_v32, %v421_v31 }
  0x7c   : > { %1122 = vmatpush1.bf16.msra.mxu1 %v2146_v34  ;;  %v273_v34 = vand.u32 15, %v271_v30  ;;  %v2217_v30 = vld [vmem:[%s2917_s3 + $0x224] ss:$8 sps:$4 sm:$0xff]  }
  0x7d   : > { %1123 = vmatprep.subr.bf16.mxu1 %v2154_v37  ;;  %v426_v37 = vrot.slane %v1733_v32, %v425_v33  ;;  %v2215_v32 = vld [vmem:[%s2917_s3 + $0x220] ss:$8 sps:$4 sm:$0xff]  }
  0x7e   : > { %vm2753_vm1 = vcmp.le.s32.totalorder %v273_v34, 14  ;;  %v2220_v34 = vld [vmem:[%s2917_s3 + $0x234] ss:$8 sps:$4 sm:$0xff]  }
  0x80   : > { %1124 = vmatpush1.bf16.msra.mxu1 %v2152_v38 }
  0x81   : > { %1125 = vmatprep.subr.bf16.mxu1 %v2160_v41 }
  0x84   : > { %1126 = vmatpush1.bf16.msra.mxu1 %v2158_v42 }
  0x85   : > { %1127 = vmatprep.subr.bf16.mxu1 %v2166_v45 }
  0x88   : > { %1128 = vmatpush1.bf16.msra.mxu1 %v2164_v46 }
  0x89   : > { %1129 = vmatprep.subr.bf16.mxu1 %v2172_v49 }
  0x8c   : > { %1130 = vmatpush1.bf16.msra.mxu1 %v2170_v50 }
  0x8d   : > { %1131 = vmatprep.subr.bf16.mxu1 %v2178_v53 }
  0x90   : > { %1132 = vmatpush1.bf16.msra.mxu1 %v2176_v54 }
  0x91   : > { %1133 = vmatprep.subr.bf16.mxu1 %v2184_v57 }
  0x94   : > { %1134 = vmatpush1.bf16.msra.mxu1 %v2182_v58 }
  0x95   : > { %1135 = vmatprep.subr.bf16.mxu1 %v2190_v61 }
  0x98   : > { %1136 = vmatpush1.bf16.msra.mxu1 %v2188_v62 }
  0x99   : > { %1137 = vmatprep.subr.bf16.mxu1 %v2196_v1 }
  0x9c   : > { %1138 = vmatpush1.bf16.msra.mxu1 %v2194_v2 }
  0x9d   : > { %1139 = vmatprep.subr.bf16.mxu1 %v2202_v4 }
  0xa0   : > { %1140 = vmatpush1.bf16.msra.mxu1 %v2200_v6 }
  0xa1   : > { %1141 = vmatprep.subr.bf16.mxu1 %v2208_v8 }
  0xa4   : > { %1142 = vmatpush1.bf16.msra.mxu1 %v2206_v10 }
  0xfa   : > { %v409_v12 = vpop.f32.mrb[0].mxu1 }
  0xfb   : > { %v411_v13 = vpop.f32.mrb[1].mxu1  ;;  %v429_v42 = vadd.f32 %v422_v35, %v409_v12 }
  0xfc   : > { %v413_v14 = vpop.f32.mrb[2].mxu1  ;;  %v724_v18 = vpop.f32.mrb[0].mxu0  ;;  %v430_v47 = vadd.f32 %v426_v37, %v411_v13 }
  0xfd   : > { %v415_v15 = vpop.f32.mrb[3].mxu1  ;;  %v733_v19 = vrot.slane %v724_v18, 1  ;;  %v726_v20 = vpop.f32.mrb[1].mxu0  ;;  %v431_v48 = vadd.f32 %v422_v35, %v413_v14  ;;  %v2218_v35 = vld [vmem:[%s2917_s3 + $0x230] ss:$8 sps:$4 sm:$0xff]  }
  0xfe   : > { %v734_v21 = vrot.slane %v726_v20, 1  ;;  %v728_v22 = vpop.f32.mrb[2].mxu0  ;;  %v432_v51 = vadd.f32 %v426_v37, %v415_v15  ;;  %v2221_v37 = vld [vmem:[%s2917_s3 + $0x240] ss:$8 sps:$4 sm:$0xff]  }
  0xff   : > { %v735_v23 = vrot.slane %v728_v22, 1  ;;  %v730_v24 = vpop.f32.mrb[3].mxu0 }
 0x100   : > { %v736_v25 = vrot.slane %v730_v24, 1 }
 0x101   : > { %v738_v26 = vsel %vm737_vm0, %v733_v19, %v735_v23  ;;  %v740_v27 = vsel %vm737_vm0, %v735_v23, %v733_v19 }
 0x102   : > { %v739_v28 = vsel %vm737_vm0, %v734_v21, %v736_v25  ;;  %v741_v29 = vsel %vm737_vm0, %v736_v25, %v734_v21  ;;  %v748_v52 = vsel %vm2753_vm1, %v740_v27, 0.0  ;;  %v2209_v27 = vld [vmem:[%s2917_s3 + $0x200] ss:$8 sps:$4 sm:$0xff]  }
 0x103   : > { %v749_v63 = vsel %vm2753_vm1, %v741_v29, 0.0  ;;  %v2212_v29 = vld [vmem:[%s2917_s3 + $0x210] ss:$8 sps:$4 sm:$0xff]  }
 0x11a   : > { %v563_v38 = vpop.f32.mrb[4].mxu1 }
 0x11b   : > { %v565_v39 = vpop.f32.mrb[5].mxu1  ;;  %v572_v43 = vrot.slane %v563_v38, 7  ;;  %v2226_v38 = vld [vmem:[%s2917_s3 + $0x254] ss:$8 sps:$4 sm:$0xff]  }
 0x11c   : > { %v567_v41 = vpop.f32.mrb[6].mxu1  ;;  %v573_v49 = vrot.slane %v565_v39, 7  ;;  %v2224_v39 = vld [vmem:[%s2917_s3 + $0x250] ss:$8 sps:$4 sm:$0xff]  }
 0x11d   : > { %v574_v45 = vrot.slane %v567_v41, 7  ;;  %v569_v46 = vpop.f32.mrb[7].mxu1  ;;  %v2229_v41 = vld [vmem:[%s2917_s3 + $0x264] ss:$8 sps:$4 sm:$0xff]  }
 0x11e   : > { %v575_v50 = vrot.slane %v569_v46, 7  ;;  %v2235_v46 = vld [vmem:[%s2917_s3 + $0x284] ss:$8 sps:$4 sm:$0xff]  }
 0x11f   : > { %v577_v53 = vsel %vm576_vm2, %v572_v43, %v574_v45  ;;  %v579_v54 = vsel %vm576_vm2, %v574_v45, %v572_v43  ;;  %v2232_v43 = vld [vmem:[%s2917_s3 + $0x274] ss:$8 sps:$4 sm:$0xff]   ;;  %v2230_v45 = vld [vmem:[%s2917_s3 + $0x270] ss:$8 sps:$4 sm:$0xff]  }
 0x120   : > { %v585_v55 = vsel %vm2758_vm3, %v579_v54, 0.0  ;;  %v591_v56 = vadd.f32 %v577_v53, %v431_v48  ;;  %v578_v57 = vsel %vm576_vm2, %v573_v49, %v575_v50  ;;  %v580_v58 = vsel %vm576_vm2, %v575_v50, %v573_v49  ;;  %v2238_v48 = vld [vmem:[%s2917_s3 + $0x294] ss:$8 sps:$4 sm:$0xff]   ;;  %v2236_v49 = vld [vmem:[%s2917_s3 + $0x290] ss:$8 sps:$4 sm:$0xff]  }
 0x121   : > { %v589_v59 = vadd.f32 %v585_v55, %v429_v42  ;;  %v586_v60 = vsel %vm2758_vm3, %v580_v58, 0.0  ;;  %v592_v61 = vadd.f32 %v578_v57, %v432_v51  ;;  %v2227_v42 = vld [vmem:[%s2917_s3 + $0x260] ss:$8 sps:$4 sm:$0xff]   ;;  %v2241_v50 = vld [vmem:[%s2917_s3 + $0x2a4] ss:$8 sps:$4 sm:$0xff]  }
 0x122   : > { %v752_v62 = vadd.f32 %v748_v52, %v591_v56  ;;  %v590_v0 = vadd.f32 %v586_v60, %v430_v47  ;;  %v2233_v47 = vld [vmem:[%s2917_s3 + $0x280] ss:$8 sps:$4 sm:$0xff]   ;;  %v2244_v52 = vld [vmem:[%s2917_s3 + $0x2b4] ss:$8 sps:$4 sm:$0xff]   ;;  %v2242_v53 = vld [vmem:[%s2917_s3 + $0x2b0] ss:$8 sps:$4 sm:$0xff]  }
 0x123   : > { %v750_v1 = vadd.f32 %v738_v26, %v589_v59  ;;  %v753_v2 = vadd.f32 %v749_v63, %v592_v61  ;;  %v2239_v51 = vld [vmem:[%s2917_s3 + $0x2a0] ss:$8 sps:$4 sm:$0xff]   ;;  %v2247_v54 = vld [vmem:[%s2917_s3 + $0x2c4] ss:$8 sps:$4 sm:$0xff]   ;;  %v2250_v56 = vld [vmem:[%s2917_s3 + $0x2d4] ss:$8 sps:$4 sm:$0xff]  }
 0x124   : > { %v1819_v3 = vmul.f32 -1.442695, %v752_v62  ;;  %v751_v4 = vadd.f32 %v739_v28, %v590_v0  ;;  %v2214_v28 = vld [vmem:[%s2917_s3 + $0x214] ss:$8 sps:$4 sm:$0xff]   ;;  %v2245_v55 = vld [vmem:[%s2917_s3 + $0x2c0] ss:$8 sps:$4 sm:$0xff]  }
 0x125   : > { %v1817_v5 = vmul.f32 -1.442695, %v750_v1  ;;  %v1820_v6 = vmul.f32 -1.442695, %v753_v2  ;;  %v2248_v57 = vld [vmem:[%s2917_s3 + $0x2d0] ss:$8 sps:$4 sm:$0xff]  }
 0x126   : > { %2257 = vpow2.f32 %v1819_v3  ;;  %v1818_v7 = vmul.f32 -1.442695, %v751_v4  ;;  %v2253_v58 = vld [vmem:[%s2917_s3 + $0x2e4] ss:$8 sps:$4 sm:$0xff]   ;;  %v2251_v59 = vld [vmem:[%s2917_s3 + $0x2e0] ss:$8 sps:$4 sm:$0xff]  }
 0x127   : > { %2259 = vpow2.f32 %v1817_v5  ;;  %v2256_v60 = vld [vmem:[%s2917_s3 + $0x2f4] ss:$8 sps:$4 sm:$0xff]   ;;  %v2254_v61 = vld [vmem:[%s2917_s3 + $0x2f0] ss:$8 sps:$4 sm:$0xff]  }
 0x128   : > { %2261 = vpow2.f32 %v1818_v7 }
 0x129   : > { %2263 = vpow2.f32 %v1820_v6 }
 0x130   : > { %v2258_v8 = vpop.eup %2257 }
 0x131   : > { %v2260_v9 = vpop.eup %2259  ;;  %v768_v10 = vadd.f32 1.0, %v2258_v8 }
 0x132   : > { %v2262_v11 = vpop.eup %2261  ;;  %v766_v12 = vadd.f32 1.0, %v2260_v9 }
 0x133   : > { %v2264_v13 = vpop.eup %2263  ;;  %2265 = vrcp.f32 %v768_v10  ;;  %v767_v14 = vadd.f32 1.0, %v2262_v11 }
 0x134   : > { %2267 = vrcp.f32 %v766_v12  ;;  %v769_v15 = vadd.f32 1.0, %v2264_v13 }
 0x135   : > { %2269 = vrcp.f32 %v767_v14 }
 0x136   : > { %2271 = vrcp.f32 %v769_v15 }
 0x13d   : > { %v2266_v16 = vpop.eup %2265 }
 0x13e   : > { %v2268_v18 = vpop.eup %2267  ;;  %v780_v19 = vmul.f32 %v2266_v16, %v752_v62  ;;  %v1734_v62 = vld [vmem:[%s2915_s1 + $0x3] ss:$4 sm:$0x3] }
 0x13f   : > { %v2270_v20 = vpop.eup %2269  ;;  %v778_v21 = vmul.f32 %v2268_v18, %v750_v1  ;;  %v788_v1 = vrot.slane %v1734_v62, %v421_v31 }
 0x140   : > { %v2272_v22 = vpop.eup %2271  ;;  %v779_v23 = vmul.f32 %v2270_v20, %v751_v4 }
 0x141   : > { %v781_v24 = vmul.f32 %v2272_v22, %v753_v2  ;;  %v2778_v25 = vpack.c.bf16 %v780_v19, %v778_v21  ;;  %v792_v2 = vrot.slane %v1734_v62, %v425_v33 }
 0x143   : > { %v783_v26 = vpack.c.bf16 %v781_v24, %v779_v23 }
 0x145   : > { %1143 = vmatprep.mubr.bf16.mxu1 %v783_v26  ;;  %1382 = vmatprep.mubr.bf16.mxu0 %v783_v26 }
 0x146   : > { %1144 = vmatmul.mubr.bf16.vlgmr.msra.gmra.mrb[8].mxu1 %v2778_v25  ;;  %1383 = vmatmul.mubr.bf16.vlgmr.msra.gmra.mrb[4].mxu0 %v2778_v25 }
 0x147   : > { %1603 = vmatpush1.bf16.msra.mxu0 %v2209_v27  ;;  %1634 = vmatprep.mubr.bf16.mxu0 %v783_v26 }
 0x148   : > { %1604 = vmatprep.subr.bf16.mxu0 %v2214_v28 }
 0x14b   : > { %1605 = vmatpush1.bf16.msra.mxu0 %v2212_v29 }
 0x14c   : > { %1606 = vmatprep.subr.bf16.mxu0 %v2217_v30 }
 0x14f   : > { %1607 = vmatpush1.bf16.msra.mxu0 %v2215_v32 }
 0x150   : > { %1608 = vmatprep.subr.bf16.mxu0 %v2220_v34 }
 0x153   : > { %1609 = vmatpush1.bf16.msra.mxu0 %v2218_v35 }
 0x154   : > { %1610 = vmatprep.subr.bf16.mxu0 %v2223_v36 }
 0x157   : > { %1611 = vmatpush1.bf16.msra.mxu0 %v2221_v37 }
 0x158   : > { %1612 = vmatprep.subr.bf16.mxu0 %v2226_v38 }
 0x15b   : > { %1613 = vmatpush1.bf16.msra.mxu0 %v2224_v39 }
 0x15c   : > { %1614 = vmatprep.subr.bf16.mxu0 %v2229_v41 }
 0x15f   : > { %1615 = vmatpush1.bf16.msra.mxu0 %v2227_v42 }
 0x160   : > { %1616 = vmatprep.subr.bf16.mxu0 %v2232_v43 }
 0x163   : > { %1617 = vmatpush1.bf16.msra.mxu0 %v2230_v45 }
 0x164   : > { %1618 = vmatprep.subr.bf16.mxu0 %v2235_v46 }
 0x167   : > { %1619 = vmatpush1.bf16.msra.mxu0 %v2233_v47 }
 0x168   : > { %1620 = vmatprep.subr.bf16.mxu0 %v2238_v48 }
 0x16b   : > { %1621 = vmatpush1.bf16.msra.mxu0 %v2236_v49 }
 0x16c   : > { %1622 = vmatprep.subr.bf16.mxu0 %v2241_v50 }
 0x16f   : > { %1623 = vmatpush1.bf16.msra.mxu0 %v2239_v51 }
 0x170   : > { %1624 = vmatprep.subr.bf16.mxu0 %v2244_v52 }
 0x173   : > { %1625 = vmatpush1.bf16.msra.mxu0 %v2242_v53 }
 0x174   : > { %1626 = vmatprep.subr.bf16.mxu0 %v2247_v54 }
 0x177   : > { %1627 = vmatpush1.bf16.msra.mxu0 %v2245_v55 }
 0x178   : > { %1628 = vmatprep.subr.bf16.mxu0 %v2250_v56 }
 0x17b   : > { %1629 = vmatpush1.bf16.msra.mxu0 %v2248_v57 }
 0x17c   : > { %1630 = vmatprep.subr.bf16.mxu0 %v2253_v58 }
 0x17f   : > { %1631 = vmatpush1.bf16.msra.mxu0 %v2251_v59 }
 0x180   : > { %1632 = vmatprep.subr.bf16.mxu0 %v2256_v60 }
 0x183   : > { %1633 = vmatpush1.bf16.msra.mxu0 %v2254_v61 }
 0x186   : > { %1635 = vmatmul.mubr.bf16.vlgmr.msra.gmra.mrb[8].mxu0 %v2778_v25 }
 0x219   : > { %v1145_v63 = vpop.f32.mrb[8].mxu1  ;;  %v1384_v0 = vpop.f32.mrb[4].mxu0 }
 0x21a   : > { %v1147_v3 = vpop.f32.mrb[9].mxu1  ;;  %v1386_v4 = vpop.f32.mrb[5].mxu0  ;;  %v1393_v7 = vrot.slane %v1384_v0, 7  ;;  %v2000_v15 = vadd.f32 %v1145_v63, %v788_v1 }
 0x21b   : > { %v1149_v5 = vpop.f32.mrb[10].mxu1  ;;  %v1388_v6 = vpop.f32.mrb[6].mxu0  ;;  %v1394_v12 = vrot.slane %v1386_v4, 7  ;;  %v2001_v16 = vadd.f32 %v1147_v3, %v792_v2 }
 0x21c   : > { %v2002_v8 = vadd.f32 %v1149_v5, %v788_v1  ;;  %v1395_v9 = vrot.slane %v1388_v6, 7  ;;  %v1151_v10 = vpop.f32.mrb[11].mxu1  ;;  %v1390_v11 = vpop.f32.mrb[7].mxu0 }
 0x21d   : > { %v2003_v13 = vadd.f32 %v1151_v10, %v792_v2  ;;  %v1396_v14 = vrot.slane %v1390_v11, 7 }
 0x21e   : > { %v1397_v31 = vsel %vm576_vm2, %v1393_v7, %v1395_v9  ;;  %v1399_v33 = vsel %vm576_vm2, %v1395_v9, %v1393_v7 }
 0x21f   : > { %v1401_v18 = vsel %vm2758_vm3, %v1399_v33, 0.0  ;;  %v1407_v19 = vadd.f32 %v2002_v8, %v1397_v31  ;;  %v1398_v20 = vsel %vm576_vm2, %v1394_v12, %v1396_v14  ;;  %v1400_v21 = vsel %vm576_vm2, %v1396_v14, %v1394_v12 }
 0x220   : > { %v1405_v22 = vadd.f32 %v2000_v15, %v1401_v18  ;;  %v1402_v23 = vsel %vm2758_vm3, %v1400_v21, 0.0  ;;  %v1408_v24 = vadd.f32 %v2003_v13, %v1398_v20 }
 0x221   : > { %v1406_v25 = vadd.f32 %v2001_v16, %v1402_v23 }
 0x259   : > { %v1636_v26 = vpop.f32.mrb[8].mxu0 }
 0x25a   : > { %v1638_v27 = vpop.f32.mrb[9].mxu0  ;;  %v1645_v29 = vrot.slane %v1636_v26, 1 }
 0x25b   : > { %v1640_v28 = vpop.f32.mrb[10].mxu0  ;;  %v1646_v34 = vrot.slane %v1638_v27, 1 }
 0x25c   : > { %v1647_v30 = vrot.slane %v1640_v28, 1  ;;  %v1642_v32 = vpop.f32.mrb[11].mxu0 }
 0x25d   : > { %v1648_v35 = vrot.slane %v1642_v32, 1 }
 0x25e   : > { %v1649_v36 = vsel %vm737_vm0, %v1645_v29, %v1647_v30  ;;  %v1651_v44 = vsel %vm737_vm0, %v1647_v30, %v1645_v29 }
 0x25f   : > { %v1655_v37 = vsel %vm2753_vm1, %v1651_v44, 0.0  ;;  %v1657_v38 = vadd.f32 %v1649_v36, %v1405_v22  ;;  %v1650_v39 = vsel %vm737_vm0, %v1646_v34, %v1648_v35  ;;  %v1652_v41 = vsel %vm737_vm0, %v1648_v35, %v1646_v34 }
 0x260   : > { %v1659_v42 = vadd.f32 %v1655_v37, %v1407_v19  ;;  %v1656_v43 = vsel %vm2753_vm1, %v1652_v41, 0.0  ;;  %v1658_v45 = vadd.f32 %v1650_v39, %v1406_v25 }
 0x261   : > { %1661 = vst [vmem:[%s228_s9] sm:$0xff] %v1657_v38  ;;  %v1660_v46 = vadd.f32 %v1656_v43, %v1408_v24 }
 0x262   : > { %1663 = vst [vmem:[%s228_s9 + $0x10] sm:$0xff] %v1659_v42  ;;  %1662 = vst [vmem:[%s228_s9 + $0x8] sm:$0xff] %v1658_v45 }
 0x263   : > { %1664 = vst [vmem:[%s228_s9 + $0x18] sm:$0xff] %v1660_v46 }
 0x264 PF: > { %s15_s18 = sadd.s32 1, %s2279_s18  }
 0x265   : > { %p12_p4 = scmp.ge.s32.totalorder %s15_s18, 4  }
 0x267   :  { %14 = sbr.rel (!%p12_p4) target bundleno = 1 (0x1), region = 76 }

</bundles_post_ra>
